<compile_context>
chip_gen: v7x
topology: tpu7x:2x2x1
jax: 0.10.0
libtpu: 0.0.40
codegen_flags: <defaults>
</compile_context>

<pallas_src>
import functools
import math

import jax
import jax.numpy as jnp
from jax.experimental import pallas as pl
from jax.experimental.pallas import tpu as pltpu


def _round_up(x, m):
    return (x + m - 1) // m * m


# --------------------------------------------------------------------------- #
# Kernels: one lane-dense matmul per M block, no reduction axis, no scratch.
# --------------------------------------------------------------------------- #
def _vn_linear_bias_kernel(x_ref, w_ref, b_ref, o_ref):
    # In-kernel cast of the activations to the MXU dtype (no XLA pre-pass).
    x = x_ref[...].astype(w_ref.dtype)
    acc = jnp.dot(x, w_ref[...], preferred_element_type=jnp.float32)
    o_ref[...] = (acc + b_ref[...]).astype(o_ref.dtype)


def _vn_linear_kernel(x_ref, w_ref, o_ref):
    x = x_ref[...].astype(w_ref.dtype)
    o_ref[...] = jnp.dot(x, w_ref[...],
                         preferred_element_type=jnp.float32).astype(o_ref.dtype)


# --------------------------------------------------------------------------- #
# Parameter preparation (do this ONCE at module init, not per forward call).
# --------------------------------------------------------------------------- #
def vn_linear_init_params(weight_oc, bias=None, *, mxu_dtype=jnp.bfloat16):
    """Expand torch nn.Linear params for the fused VNLinear kernel.

    weight_oc : (C_out, C_in)  -- torch nn.Linear.weight layout.
    bias      : (C_out,) or None.

    Returns {"w_exp": (3*C_in, 3*C_out) mxu_dtype[, "b_exp": (1, 3*C_out) f32]}
    with W_exp[c*3+d, o*3+e] = weight_oc[o, c] * delta(d, e), so that
        y.reshape(m, 3*C_out) = x.reshape(m, 3*C_in) @ W_exp + b_exp
    reproduces Linear(x.transpose(-2,-1)).transpose(-2,-1) with no relayout of x/y.
    """
    c_out, c_in = weight_oc.shape
    w_io = weight_oc.T                                         # (C_in, C_out)
    eye3 = jnp.eye(3, dtype=w_io.dtype)
    w_exp = (w_io[:, None, :, None] * eye3[None, :, None, :])  # (C_in,3,C_out,3)
    w_exp = w_exp.reshape(3 * c_in, 3 * c_out).astype(mxu_dtype)
    params = {"w_exp": w_exp}
    if bias is not None:
        b_exp = jnp.broadcast_to(bias.astype(jnp.float32)[:, None], (c_out, 3))
        params["b_exp"] = b_exp.reshape(1, 3 * c_out)
    return params


# --------------------------------------------------------------------------- #
# VNLinear forward
# --------------------------------------------------------------------------- #
def vn_linear_apply(x, w_exp, b_exp=None, *, bm=512, out_dtype=jnp.float32,
                    vmem_limit_bytes=48 * 1024 * 1024):
    """VNLinear.forward.

    x     : (..., C_in, 3)  float32 (or anything castable to the MXU dtype)
    w_exp : (3*C_in, 3*C_out)  pre-expanded weight (see vn_linear_init_params)
    b_exp : (1, 3*C_out) or (3*C_out,) f32, or None
    ->      (..., C_out, 3) in out_dtype
    """
    *lead, c_in, three = x.shape
    assert three == 3, "VNLinear expects trailing xyz axis of size 3"
    K, N = w_exp.shape
    assert K == 3 * c_in and N % 3 == 0
    c_out = N // 3
    m = math.prod(lead) if lead else 1

    # Free (metadata-only) reshape: row-major (..., C_in, 3) -> (m, 3*C_in).
    x2 = x.reshape(m, K)

    # M tile: large blocks, but keep >= 2 blocks so v7x megacore can split M.
    if m <= 8:
        bm_eff = m                               # full-dim block (always legal)
    else:
        bm_eff = max(8, min(bm, _round_up((m + 1) // 2, 8)))
    grid = (pl.cdiv(m, bm_eff),)                 # non-divisible tail is masked

    x_spec = pl.BlockSpec((bm_eff, K), lambda i: (i, 0))
    w_spec = pl.BlockSpec((K, N), lambda i: (0, 0))      # resident across M loop
    o_spec = pl.BlockSpec((bm_eff, N), lambda i: (i, 0))
    cparams = pltpu.CompilerParams(
        dimension_semantics=("parallel",),
        vmem_limit_bytes=vmem_limit_bytes,       # conservative for v7x (64 MiB)
    )
    out_shape = jax.ShapeDtypeStruct((m, N), out_dtype)

    if b_exp is not None:
        if b_exp.ndim == 1:
            b_exp = b_exp.reshape(1, N)
        y2 = pl.pallas_call(
            _vn_linear_bias_kernel,
            out_shape=out_shape,
            grid=grid,
            in_specs=[x_spec, w_spec, pl.BlockSpec((1, N), lambda i: (0, 0))],
            out_specs=o_spec,
            compiler_params=cparams,
        )(x2, w_exp, b_exp)
    else:
        y2 = pl.pallas_call(
            _vn_linear_kernel,
            out_shape=out_shape,
            grid=grid,
            in_specs=[x_spec, w_spec],
            out_specs=o_spec,
            compiler_params=cparams,
        )(x2, w_exp)

    # Free reshape back to the module's natural layout.
    return y2.reshape(*lead, c_out, 3)


# --------------------------------------------------------------------------- #
if __name__ == "__main__":
    # Small shapes consistent with VNLinear: x [B, N_samples, C_in, 3].
    # m = B*NS = 128 points -> grid (2,) with bm_eff = 64 (both blocks full).
    B, NS = 2, 64
    C_IN, C_OUT = 160, 192

    key = jax.random.PRNGKey(0)
    kx, kw, kb = jax.random.split(key, 3)

    x = jax.random.normal(kx, (B, NS, C_IN, 3), jnp.float32)
    # nn.Linear.weight layout is (out, in).
    W_torch = 0.15 * jax.random.normal(kw, (C_OUT, C_IN), jnp.float32)
    b = 0.5 * jax.random.normal(kb, (C_OUT,), jnp.float32)

    # One-time parameter expansion / bf16 cast (module init time).
    params = vn_linear_init_params(W_torch, b, mxu_dtype=jnp.bfloat16)

    fwd = jax.jit(functools.partial(vn_linear_apply, bm=512,
                                    out_dtype=jnp.float32))
    y = fwd(x, params["w_exp"], params["b_exp"])
    jax.block_until_ready(y)

    # Pure-JAX reference of the PyTorch forward (high precision).
    ref = jnp.einsum("bnck,oc->bnok", x, W_torch,
                     precision=jax.lax.Precision.HIGHEST) + b[None, None, :, None]

    assert y.shape == (B, NS, C_OUT, 3) and y.dtype == jnp.float32
    assert bool(jnp.all(jnp.isfinite(y)))
    max_err = float(jnp.max(jnp.abs(y - ref)))
    # bf16 MXU operands with f32 accumulation: expected max abs err ~2e-2 here.
    # (Pass mxu_dtype=jnp.float32 to vn_linear_init_params for tighter parity.)
    assert max_err < 1e-1, f"max abs error too large: {max_err}"

    print("KERNEL_OK")
</pallas_src>

<mosaic_0001>
module attributes {stable_mosaic.version = 11 : i64} {
  func.func @_vn_linear_bias_kernel(%arg0: i32, %arg1: memref<64x480xf32, #tpu.memory_space<vmem>>, %arg2: memref<480x576xbf16, #tpu.memory_space<vmem>>, %arg3: memref<1x576xf32, #tpu.memory_space<vmem>>, %arg4: memref<64x576xf32, #tpu.memory_space<vmem>>) attributes {dimension_semantics = [#tpu.dimension_semantics<parallel>], iteration_bounds = array<i64: 2>, scalar_prefetch = 0 : i64, scratch_operands = 0 : i64, tpu.core_type = #tpu.core_type<tc>, window_params = [{transform_indices = @transform_0, window_bounds = array<i64: 64, 480>}, {pipeline_mode = #tpu.pipeline_mode<synchronous>, transform_indices = @transform_1, window_bounds = array<i64: 480, 576>}, {pipeline_mode = #tpu.pipeline_mode<synchronous>, transform_indices = @transform_2, window_bounds = array<i64: 1, 576>}, {transform_indices = @transform_3, window_bounds = array<i64: 64, 576>}]} {
    %c0 = arith.constant 0 : index
    %c0_0 = arith.constant 0 : index
    %0 = vector.load %arg1[%c0, %c0_0] : memref<64x480xf32, #tpu.memory_space<vmem>>, vector<64x480xf32>
    %1 = arith.truncf %0 : vector<64x480xf32> to vector<64x480xbf16>
    %c0_1 = arith.constant 0 : index
    %c0_2 = arith.constant 0 : index
    %2 = vector.load %arg2[%c0_1, %c0_2] : memref<480x576xbf16, #tpu.memory_space<vmem>>, vector<480x576xbf16>
    %cst = arith.constant dense<0.000000e+00> : vector<64x576xf32>
    %3 = tpu.matmul %1, %2, %cst {dimension_numbers = #tpu.dot_dimension_numbers<[1], [0], [0], [1], [0, 0, 1, 1], [], []>} : vector<64x480xbf16>, vector<480x576xbf16>, vector<64x576xf32> -> vector<64x576xf32>
    %c0_3 = arith.constant 0 : index
    %c0_4 = arith.constant 0 : index
    %4 = vector.load %arg3[%c0_3, %c0_4] : memref<1x576xf32, #tpu.memory_space<vmem>>, vector<1x576xf32>
    %5 = vector.broadcast %4 : vector<1x576xf32> to vector<64x576xf32>
    %6 = arith.addf %3, %5 : vector<64x576xf32>
    %c0_5 = arith.constant 0 : index
    %c0_6 = arith.constant 0 : index
    %7 = vector.load %arg4[%c0_5, %c0_6] : memref<64x576xf32, #tpu.memory_space<vmem>>, vector<64x576xf32>
    tpu.vector_store %arg4[%c0_5, %c0_6], %6 {strides = array<i32>} : memref<64x576xf32, #tpu.memory_space<vmem>>, vector<64x576xf32>,
    return
  }
  func.func @transform_0(%arg0: i32) -> (i32, i32) {
    %c0_i32 = arith.constant 0 : i32
    %c0_i32_0 = arith.constant 0 : i32
    return %arg0, %c0_i32 : i32, i32
  }
  func.func @transform_1(%arg0: i32) -> (i32, i32) {
    %c0_i32 = arith.constant 0 : i32
    %c0_i32_0 = arith.constant 0 : i32
    %c0_i32_1 = arith.constant 0 : i32
    return %c0_i32, %c0_i32_0 : i32, i32
  }
  func.func @transform_2(%arg0: i32) -> (i32, i32) {
    %c0_i32 = arith.constant 0 : i32
    %c0_i32_0 = arith.constant 0 : i32
    %c0_i32_1 = arith.constant 0 : i32
    return %c0_i32, %c0_i32_0 : i32, i32
  }
  func.func @transform_3(%arg0: i32) -> (i32, i32) {
    %c0_i32 = arith.constant 0 : i32
    %c0_i32_0 = arith.constant 0 : i32
    return %arg0, %c0_i32 : i32, i32
  }
}

</mosaic_0001>

<bundles_post_ra>
// kernel: vn_linear_apply.1
= control target key start
LH: loop header
LB: loop body
LE: loop exit
PB: predicated region body
PF: predicated region fallthrough
CT: control target
= control target key end

     0   :  { %s2277_s12 = smov 0   ;;  %s2992_s0 = inlined_call_operand.vmem [shape: f32[128,480], index: 0, kind: input, shape index: {}]   ;;  %s2993_s1 = inlined_call_operand.vmem [shape: bf16[480,576], index: 1, kind: input, shape index: {}]   ;;  %s2994_s2 = inlined_call_operand.vmem [shape: f32[1,576], index: 2, kind: input, shape index: {}]   ;;  %s2995_s3 = inlined_call_operand.vmem [shape: f32[128,576], index: 3, kind: output, shape index: {}]  }
   0x1 LB: > { %s1749_s13 = sadd.s32 4294967295, %s2254_s12   ;;  %p1753_p0 = scmp.ge.s32.totalorder %s2254_s12, 1  ;;  %s2254_s12 = sphi %s2277_s12, %s13_s12  }
   0x2   : > { %p139_p1 = scmp.lt.s32.totalorder %s2254_s12, 3 }
   0x4   : > { %p140_p2 = pnand %p1753_p0, %p139_p1 }
   0x5   : > { %v2038_v0 = vld [vmem:[%s2993_s1 + $0x4] ss:$20 sps:$4 sm:$0xff] (!%p140_p2)   ;;  %v2040_v1 = vld [vmem:[%s2993_s1 + $0xc] ss:$20 sps:$4 sm:$0xff] (!%p140_p2)   ;;  %v2043_v3 = vld [vmem:[%s2993_s1 + $0x8] ss:$20 sps:$4 sm:$0xff] (!%p140_p2)  }
   0x6   : > { %143 = sbr.rel (%p140_p2) target bundleno = 423 (0x1a7), region = 32  ;;  %1228 = vmatprep.subr.bf16.mxu0 (!%p140_p2), %v2038_v0  ;;  %v2042_v2 = vld [vmem:[%s2993_s1] ss:$20 sps:$4 sm:$0xff] (!%p140_p2)   ;;  %1374 = vmatprep.subr.bf16.mxu1 (!%p140_p2), %v2040_v1  ;;  %v2048_v6 = vld [vmem:[%s2993_s1 + $0x28] ss:$20 sps:$4 sm:$0xff] (!%p140_p2)   ;;  %s1754_s24 = sshll.u32 (!%p140_p2), %s1749_s13, 3 }
   0x7   : > { %v2044_v4 = vld [vmem:[%s2993_s1 + $0x2c] ss:$20 sps:$4 sm:$0xff] (!%p140_p2)   ;;  %1229 = vmatpush1.bf16.msra.mxu0 (!%p140_p2), %v2042_v2  ;;  %1375 = vmatpush1.bf16.msra.mxu1 (!%p140_p2), %v2043_v3  ;;  %v2046_v5 = vld [vmem:[%s2993_s1 + $0x34] ss:$20 sps:$4 sm:$0xff] (!%p140_p2)   ;;  %v2049_v7 = vld [vmem:[%s2993_s1 + $0x30] ss:$20 sps:$4 sm:$0xff] (!%p140_p2)  }
   0x8   : > { %1230 = vmatprep.subr.bf16.mxu0 (!%p140_p2), %v2044_v4  ;;  %1376 = vmatprep.subr.bf16.mxu1 (!%p140_p2), %v2046_v5  ;;  %v2050_v8 = vld [vmem:[%s2993_s1 + $0x54] ss:$20 sps:$4 sm:$0xff] (!%p140_p2)   ;;  %v2052_v9 = vld [vmem:[%s2993_s1 + $0x5c] ss:$20 sps:$4 sm:$0xff] (!%p140_p2)   ;;  %v2055_v11 = vld [vmem:[%s2993_s1 + $0x58] ss:$20 sps:$4 sm:$0xff] (!%p140_p2)  }
   0x9   : > { %v2054_v10 = vld [vmem:[%s2993_s1 + $0x50] ss:$20 sps:$4 sm:$0xff] (!%p140_p2)   ;;  %v2060_v14 = vld [vmem:[%s2993_s1 + $0x78] ss:$20 sps:$4 sm:$0xff] (!%p140_p2)   ;;  %v2061_v15 = vld [vmem:[%s2993_s1 + $0x80] ss:$20 sps:$4 sm:$0xff] (!%p140_p2)  }
   0xa   : > { %v2056_v12 = vld [vmem:[%s2993_s1 + $0x7c] ss:$20 sps:$4 sm:$0xff] (!%p140_p2)   ;;  %v2058_v13 = vld [vmem:[%s2993_s1 + $0x84] ss:$20 sps:$4 sm:$0xff] (!%p140_p2)   ;;  %v2064_v17 = vld [vmem:[%s2993_s1 + $0xac] ss:$20 sps:$4 sm:$0xff] (!%p140_p2)  }
   0xb   : > { %1231 = vmatpush1.bf16.msra.mxu0 (!%p140_p2), %v2048_v6  ;;  %1377 = vmatpush1.bf16.msra.mxu1 (!%p140_p2), %v2049_v7  ;;  %v2062_v16 = vld [vmem:[%s2993_s1 + $0xa4] ss:$20 sps:$4 sm:$0xff] (!%p140_p2)   ;;  %v2066_v18 = vld [vmem:[%s2993_s1 + $0xa0] ss:$20 sps:$4 sm:$0xff] (!%p140_p2)   ;;  %v2067_v19 = vld [vmem:[%s2993_s1 + $0xa8] ss:$20 sps:$4 sm:$0xff] (!%p140_p2)  }
   0xc   : > { %1232 = vmatprep.subr.bf16.mxu0 (!%p140_p2), %v2050_v8  ;;  %1378 = vmatprep.subr.bf16.mxu1 (!%p140_p2), %v2052_v9  ;;  %v2068_v20 = vld [vmem:[%s2993_s1 + $0xcc] ss:$20 sps:$4 sm:$0xff] (!%p140_p2)   ;;  %v2070_v21 = vld [vmem:[%s2993_s1 + $0xd4] ss:$20 sps:$4 sm:$0xff] (!%p140_p2)   ;;  %v2073_v23 = vld [vmem:[%s2993_s1 + $0xd0] ss:$20 sps:$4 sm:$0xff] (!%p140_p2)  }
   0xd   : > { %v2072_v22 = vld [vmem:[%s2993_s1 + $0xc8] ss:$20 sps:$4 sm:$0xff]   ;;  %v2078_v26 = vld [vmem:[%s2993_s1 + $0xf0] ss:$20 sps:$4 sm:$0xff]   ;;  %v2079_v27 = vld [vmem:[%s2993_s1 + $0xf8] ss:$20 sps:$4 sm:$0xff]  }
   0xe   : > { %v2074_v24 = vld [vmem:[%s2993_s1 + $0xf4] ss:$20 sps:$4 sm:$0xff]   ;;  %v2076_v25 = vld [vmem:[%s2993_s1 + $0xfc] ss:$20 sps:$4 sm:$0xff]   ;;  %v2082_v29 = vld [vmem:[%s2993_s1 + $0x124] ss:$20 sps:$4 sm:$0xff]  }
   0xf   : > { %1233 = vmatpush1.bf16.msra.mxu0 %v2054_v10  ;;  %1379 = vmatpush1.bf16.msra.mxu1 %v2055_v11  ;;  %v2080_v28 = vld [vmem:[%s2993_s1 + $0x11c] ss:$20 sps:$4 sm:$0xff]   ;;  %v2084_v30 = vld [vmem:[%s2993_s1 + $0x118] ss:$20 sps:$4 sm:$0xff]   ;;  %v2085_v31 = vld [vmem:[%s2993_s1 + $0x120] ss:$20 sps:$4 sm:$0xff]  }
  0x10   : > { %1234 = vmatprep.subr.bf16.mxu0 %v2056_v12  ;;  %1380 = vmatprep.subr.bf16.mxu1 %v2058_v13  ;;  %v2086_v32 = vld [vmem:[%s2993_s1 + $0x144] ss:$20 sps:$4 sm:$0xff]   ;;  %p166_p3 = scmp.lt.s32.totalorder %s1754_s24, 15  ;;  %v2088_v33 = vld [vmem:[%s2993_s1 + $0x14c] ss:$20 sps:$4 sm:$0xff]   ;;  %vm1215_vm0 = vcmask 785408  }
  0x11   : > { %v2090_v34 = vld [vmem:[%s2993_s1 + $0x140] ss:$20 sps:$4 sm:$0xff]   ;;  %v2091_v35 = vld [vmem:[%s2993_s1 + $0x148] ss:$20 sps:$4 sm:$0xff]   ;;  %v2097_v39 = vld [vmem:[%s2993_s1 + $0x170] ss:$20 sps:$4 sm:$0xff]  }
  0x12   : > { %v2092_v36 = vld [vmem:[%s2993_s1 + $0x16c] ss:$20 sps:$4 sm:$0xff]   ;;  %s2997_s24 = smov (!%p166_p3, %s1754_s24), 15  ;;  %v2094_v37 = vld [vmem:[%s2993_s1 + $0x174] ss:$20 sps:$4 sm:$0xff]   ;;  %vm1654_vm1 = vcmask 523264  }
  0x13   : > { %1235 = vmatpush1.bf16.msra.mxu0 %v2060_v14  ;;  %1381 = vmatpush1.bf16.msra.mxu1 %v2061_v15  ;;  %v2096_v38 = vld [vmem:[%s2993_s1 + $0x168] ss:$20 sps:$4 sm:$0xff]   ;;  %s1923_s21 = sshll.u32 %s2997_s24, 5  ;;  %v2102_v42 = vld [vmem:[%s2993_s1 + $0x190] ss:$20 sps:$4 sm:$0xff]   ;;  %s2028_s27 = smul.u32 40, %s2997_s24 }
  0x14   : > { %1236 = vmatprep.subr.bf16.mxu0 %v2062_v16  ;;  %1382 = vmatprep.subr.bf16.mxu1 %v2064_v17  ;;  %v2098_v40 = vld [vmem:[%s2993_s1 + $0x194] ss:$20 sps:$4 sm:$0xff]   ;;  %v2100_v41 = vld [vmem:[%s2993_s1 + $0x19c] ss:$20 sps:$4 sm:$0xff]   ;;  %v2103_v43 = vld [vmem:[%s2993_s1 + $0x198] ss:$20 sps:$4 sm:$0xff]   ;;  %s2425_s4 = scalar_lea.vmem %s2992_s0, %s1923_s21 }
  0x15   : > { %v2104_v44 = vld [vmem:[%s2993_s1 + $0x1bc] ss:$20 sps:$4 sm:$0xff]   ;;  %v2106_v45 = vld [vmem:[%s2993_s1 + $0x1c4] ss:$20 sps:$4 sm:$0xff]   ;;  %v181_v46 = vld [vmem:[%s2425_s4 + $0x8] sm:$0xff]  ;;  %s2905_s30 = scalar_lea.vmem %s2995_s3, %s2028_s27 }
  0x16   : > { %v185_v47 = vld [vmem:[%s2425_s4 + $0x28] sm:$0xff]  ;;  %v2109_v49 = vld [vmem:[%s2993_s1 + $0x1c0] ss:$20 sps:$4 sm:$0xff]   ;;  %v2110_v51 = vld [vmem:[%s2993_s1 + $0x1e4] ss:$20 sps:$4 sm:$0xff]  }
  0x17   : > { %1237 = vmatpush1.bf16.msra.mxu0 %v2066_v18  ;;  %1383 = vmatpush1.bf16.msra.mxu1 %v2067_v19  ;;  %v2108_v48 = vld [vmem:[%s2993_s1 + $0x1b8] ss:$20 sps:$4 sm:$0xff]   ;;  %v2441_v50 = vpack.c.bf16 %v185_v47, %v181_v46  ;;  %v2114_v53 = vld [vmem:[%s2993_s1 + $0x1e0] ss:$20 sps:$4 sm:$0xff]   ;;  %v2115_v54 = vld [vmem:[%s2993_s1 + $0x1e8] ss:$20 sps:$4 sm:$0xff]  }
  0x18   : > { %1238 = vmatprep.subr.bf16.mxu0 %v2068_v20  ;;  %1384 = vmatprep.subr.bf16.mxu1 %v2070_v21  ;;  %v2112_v52 = vld [vmem:[%s2993_s1 + $0x1ec] ss:$20 sps:$4 sm:$0xff]   ;;  %v2118_v56 = vld [vmem:[%s2993_s1 + $0x214] ss:$20 sps:$4 sm:$0xff]   ;;  %v2121_v58 = vld [vmem:[%s2993_s1 + $0x210] ss:$20 sps:$4 sm:$0xff]  }
  0x19   : > { %1260 = vmatprep.mubr.bf16.mxu0 %v2441_v50  ;;  %1406 = vmatprep.mubr.bf16.mxu1 %v2441_v50  ;;  %v2116_v55 = vld [vmem:[%s2993_s1 + $0x20c] ss:$20 sps:$4 sm:$0xff]   ;;  %v2120_v57 = vld [vmem:[%s2993_s1 + $0x208] ss:$20 sps:$4 sm:$0xff]   ;;  %v2126_v61 = vld [vmem:[%s2993_s1 + $0x230] ss:$20 sps:$4 sm:$0xff]  }
  0x1a   : > { %v2122_v59 = vld [vmem:[%s2993_s1 + $0x234] ss:$20 sps:$4 sm:$0xff]   ;;  %v2124_v60 = vld [vmem:[%s2993_s1 + $0x23c] ss:$20 sps:$4 sm:$0xff]   ;;  %v2127_v62 = vld [vmem:[%s2993_s1 + $0x238] ss:$20 sps:$4 sm:$0xff]  }
  0x1b   : > { %1239 = vmatpush1.bf16.msra.mxu0 %v2072_v22  ;;  %1385 = vmatpush1.bf16.msra.mxu1 %v2073_v23  ;;  %v2128_v63 = vld [vmem:[%s2993_s1 + $0x25c] ss:$20 sps:$4 sm:$0xff]   ;;  %v2130_v0 = vld [vmem:[%s2993_s1 + $0x264] ss:$20 sps:$4 sm:$0xff]   ;;  %v2133_v2 = vld [vmem:[%s2993_s1 + $0x260] ss:$20 sps:$4 sm:$0xff]  }
  0x1c   : > { %1240 = vmatprep.subr.bf16.mxu0 %v2074_v24  ;;  %1386 = vmatprep.subr.bf16.mxu1 %v2076_v25  ;;  %v2132_v1 = vld [vmem:[%s2993_s1 + $0x258] ss:$20 sps:$4 sm:$0xff]   ;;  %v180_v4 = vld [vmem:[%s2425_s4] sm:$0xff]  ;;  %v2137_v8 = vld [vmem:[%s2993_s1 + $0x288] ss:$20 sps:$4 sm:$0xff]  }
  0x1d   : > { %v2136_v3 = vld [vmem:[%s2993_s1 + $0x284] ss:$20 sps:$4 sm:$0xff]   ;;  %v2139_v6 = vld [vmem:[%s2993_s1 + $0x28c] ss:$20 sps:$4 sm:$0xff]   ;;  %v2145_v11 = vld [vmem:[%s2993_s1 + $0x2b4] ss:$20 sps:$4 sm:$0xff]  }
  0x1e   : > { %v184_v5 = vld [vmem:[%s2425_s4 + $0x20] sm:$0xff]  ;;  %v189_v12 = vld [vmem:[%s2425_s4 + $0x48] sm:$0xff]  ;;  %v2151_v20 = vld [vmem:[%s2993_s1 + $0x2dc] ss:$20 sps:$4 sm:$0xff]  }
  0x1f   : > { %1241 = vmatpush1.bf16.msra.mxu0 %v2078_v26  ;;  %1387 = vmatpush1.bf16.msra.mxu1 %v2079_v27  ;;  %v2134_v7 = vld [vmem:[%s2993_s1 + $0x280] ss:$20 sps:$4 sm:$0xff]   ;;  %v2507_v9 = vpack.c.bf16 %v184_v5, %v180_v4  ;;  %v193_v13 = vld [vmem:[%s2425_s4 + $0x68] sm:$0xff]  ;;  %v2143_v15 = vld [vmem:[%s2993_s1 + $0x2b0] ss:$20 sps:$4 sm:$0xff]  }
  0x20   : > { %1242 = vmatprep.subr.bf16.mxu0 %v2080_v28  ;;  %1388 = vmatprep.subr.bf16.mxu1 %v2082_v29  ;;  %v2142_v10 = vld [vmem:[%s2993_s1 + $0x2ac] ss:$20 sps:$4 sm:$0xff]   ;;  %v2140_v14 = vld [vmem:[%s2993_s1 + $0x2a8] ss:$20 sps:$4 sm:$0xff]   ;;  %v2523_v16 = vpack.c.bf16 %v193_v13, %v189_v12  ;;  %v2146_v21 = vld [vmem:[%s2993_s1 + $0x2d0] ss:$20 sps:$4 sm:$0xff]  }
  0x21   : > { %v2148_v17 = vld [vmem:[%s2993_s1 + $0x2d4] ss:$20 sps:$4 sm:$0xff]   ;;  %v188_v18 = vld [vmem:[%s2425_s4 + $0x40] sm:$0xff]  ;;  %v2149_v22 = vld [vmem:[%s2993_s1 + $0x2d8] ss:$20 sps:$4 sm:$0xff]  }
  0x22   : > { %v192_v19 = vld [vmem:[%s2425_s4 + $0x60] sm:$0xff]  ;;  %v2154_v24 = vld [vmem:[%s2993_s1 + $0x2fc] ss:$20 sps:$4 sm:$0xff]   ;;  %v197_v25 = vld [vmem:[%s2425_s4 + $0x88] sm:$0xff] }
  0x23   : > { %1243 = vmatpush1.bf16.msra.mxu0 %v2084_v30  ;;  %1389 = vmatpush1.bf16.msra.mxu1 %v2085_v31  ;;  %v2543_v23 = vpack.c.bf16 %v192_v19, %v188_v18  ;;  %v201_v26 = vld [vmem:[%s2425_s4 + $0xa8] sm:$0xff]  ;;  %v2157_v27 = vld [vmem:[%s2993_s1 + $0x304] ss:$20 sps:$4 sm:$0xff]   ;;  %v2155_v29 = vld [vmem:[%s2993_s1 + $0x300] ss:$20 sps:$4 sm:$0xff]  }
  0x24   : > { %1244 = vmatprep.subr.bf16.mxu0 %v2086_v32  ;;  %1390 = vmatprep.subr.bf16.mxu1 %v2088_v33  ;;  %v2152_v28 = vld [vmem:[%s2993_s1 + $0x2f8] ss:$20 sps:$4 sm:$0xff]   ;;  %v2559_v30 = vpack.c.bf16 %v201_v26, %v197_v25  ;;  %v196_v32 = vld [vmem:[%s2425_s4 + $0x80] sm:$0xff]  ;;  %v2172_v47 = vld [vmem:[%s2993_s1 + $0x374] ss:$20 sps:$4 sm:$0xff]  }
  0x25   : > { %v2160_v31 = vld [vmem:[%s2993_s1 + $0x324] ss:$20 sps:$4 sm:$0xff]   ;;  %v2196_v4 = vld [vmem:[%s2993_s1 + $0x414] ss:$20 sps:$4 sm:$0xff]   ;;  %v2199_v5 = vld [vmem:[%s2993_s1 + $0x41c] ss:$20 sps:$4 sm:$0xff]  }
  0x26   : > { %v200_v33 = vld [vmem:[%s2425_s4 + $0xa0] sm:$0xff]  ;;  %v2217_v19 = vld [vmem:[%s2993_s1 + $0x494] ss:$20 sps:$4 sm:$0xff]   ;;  %v191_v25 = vld [vmem:[%s2425_s4 + $0x58] sm:$0xff] }
  0x27   : > { %1245 = vmatpush1.bf16.msra.mxu0 %v2090_v34  ;;  %1391 = vmatpush1.bf16.msra.mxu1 %v2091_v35  ;;  %v2163_v34 = vld [vmem:[%s2993_s1 + $0x32c] ss:$20 sps:$4 sm:$0xff]   ;;  %v2208_v13 = vld [vmem:[%s2993_s1 + $0x464] ss:$20 sps:$4 sm:$0xff]  }
  0x28   : > { %1246 = vmatprep.subr.bf16.mxu0 %v2092_v36  ;;  %1392 = vmatprep.subr.bf16.mxu1 %v2094_v37  ;;  %v2158_v35 = vld [vmem:[%s2993_s1 + $0x320] ss:$20 sps:$4 sm:$0xff]   ;;  %v2161_v36 = vld [vmem:[%s2993_s1 + $0x328] ss:$20 sps:$4 sm:$0xff]   ;;  %v2579_v37 = vpack.c.bf16 %v200_v33, %v196_v32  ;;  %v2256_v32 = vmov 0  }
  0x29   : > { %v208_v46 = vld [vmem:[%s2425_s4 + $0xe0] sm:$0xff]  ;;  %v195_v26 = vld [vmem:[%s2425_s4 + $0x78] sm:$0xff] }
  0x2a   : > { %v2203_v12 = vld [vmem:[%s2993_s1 + $0x440] ss:$20 sps:$4 sm:$0xff]   ;;  %v2223_v33 = vld [vmem:[%s2993_s1 + $0x10] ss:$20 sps:$4 sm:$0xff]  }
  0x2b   : > { %1247 = vmatpush1.bf16.msra.mxu0 %v2096_v38  ;;  %1393 = vmatpush1.bf16.msra.mxu1 %v2097_v39  ;;  %v205_v38 = vld [vmem:[%s2425_s4 + $0xc8] sm:$0xff] }
  0x2c   : > { %1248 = vmatprep.subr.bf16.mxu0 %v2098_v40  ;;  %1394 = vmatprep.subr.bf16.mxu1 %v2100_v41  ;;  %v209_v39 = vld [vmem:[%s2425_s4 + $0xe8] sm:$0xff] }
  0x2d   : > { %v2166_v40 = vld [vmem:[%s2993_s1 + $0x34c] ss:$20 sps:$4 sm:$0xff]   ;;  %v2169_v41 = vld [vmem:[%s2993_s1 + $0x354] ss:$20 sps:$4 sm:$0xff]  }
  0x2e   : > { %v2214_v18 = vld [vmem:[%s2993_s1 + $0x48c] ss:$20 sps:$4 sm:$0xff]  }
  0x2f   : > { %1249 = vmatpush1.bf16.msra.mxu0 %v2102_v42  ;;  %1395 = vmatpush1.bf16.msra.mxu1 %v2103_v43  ;;  %v2164_v42 = vld [vmem:[%s2993_s1 + $0x348] ss:$20 sps:$4 sm:$0xff]   ;;  %v2592_v43 = vpack.c.bf16 %v209_v39, %v205_v38  ;;  %v194_v38 = vld [vmem:[%s2425_s4 + $0x70] sm:$0xff] }
  0x30   : > { %1250 = vmatprep.subr.bf16.mxu0 %v2104_v44  ;;  %1396 = vmatprep.subr.bf16.mxu1 %v2106_v45  ;;  %v2167_v44 = vld [vmem:[%s2993_s1 + $0x350] ss:$20 sps:$4 sm:$0xff]   ;;  %v199_v39 = vld [vmem:[%s2425_s4 + $0x98] sm:$0xff] }
  0x31   : > { %v204_v45 = vld [vmem:[%s2425_s4 + $0xc0] sm:$0xff] }
  0x33   : > { %1251 = vmatpush1.bf16.msra.mxu0 %v2108_v48  ;;  %1397 = vmatpush1.bf16.msra.mxu1 %v2109_v49  ;;  %v2175_v48 = vld [vmem:[%s2993_s1 + $0x37c] ss:$20 sps:$4 sm:$0xff]  }
  0x34   : > { %1252 = vmatprep.subr.bf16.mxu0 %v2110_v51  ;;  %1398 = vmatprep.subr.bf16.mxu1 %v2112_v52  ;;  %v183_v49 = vld [vmem:[%s2425_s4 + $0x18] sm:$0xff]  ;;  %v2610_v51 = vpack.c.bf16 %v208_v46, %v204_v45  ;;  %v2228_v46 = vld [vmem:[%s2993_s1 + $0x1a0] ss:$20 sps:$4 sm:$0xff]  }
  0x35   : > { %v187_v52 = vld [vmem:[%s2425_s4 + $0x38] sm:$0xff] }
  0x37   : > { %1253 = vmatpush1.bf16.msra.mxu0 %v2114_v53  ;;  %1399 = vmatpush1.bf16.msra.mxu1 %v2115_v54  ;;  %v2170_v53 = vld [vmem:[%s2993_s1 + $0x370] ss:$20 sps:$4 sm:$0xff]   ;;  %v2173_v54 = vld [vmem:[%s2993_s1 + $0x378] ss:$20 sps:$4 sm:$0xff]  }
  0x38   : > { %1254 = vmatprep.subr.bf16.mxu0 %v2116_v55  ;;  %1400 = vmatprep.subr.bf16.mxu1 %v2118_v56  ;;  %v2178_v55 = vld [vmem:[%s2993_s1 + $0x39c] ss:$20 sps:$4 sm:$0xff]   ;;  %v2181_v56 = vld [vmem:[%s2993_s1 + $0x3a4] ss:$20 sps:$4 sm:$0xff]  }
  0x3b   : > { %1255 = vmatpush1.bf16.msra.mxu0 %v2120_v57  ;;  %1401 = vmatpush1.bf16.msra.mxu1 %v2121_v58  ;;  %v2625_v57 = vpack.c.bf16 %v187_v52, %v183_v49  ;;  %v2176_v58 = vld [vmem:[%s2993_s1 + $0x398] ss:$20 sps:$4 sm:$0xff]   ;;  %v198_v49 = vld [vmem:[%s2425_s4 + $0x90] sm:$0xff] }
  0x3c   : > { %1256 = vmatprep.subr.bf16.mxu0 %v2122_v59  ;;  %1402 = vmatprep.subr.bf16.mxu1 %v2124_v60  ;;  %v2179_v59 = vld [vmem:[%s2993_s1 + $0x3a0] ss:$20 sps:$4 sm:$0xff]   ;;  %v2184_v60 = vld [vmem:[%s2993_s1 + $0x3c4] ss:$20 sps:$4 sm:$0xff]  }
  0x3d   : > { %v202_v52 = vld [vmem:[%s2425_s4 + $0xb0] sm:$0xff] }
  0x3f   : > { %1257 = vmatpush1.bf16.msra.mxu0 %v2126_v61  ;;  %1403 = vmatpush1.bf16.msra.mxu1 %v2127_v62  ;;  %v2187_v61 = vld [vmem:[%s2993_s1 + $0x3cc] ss:$20 sps:$4 sm:$0xff]  }
  0x40   : > { %1258 = vmatprep.subr.bf16.mxu0 %v2128_v63  ;;  %1404 = vmatprep.subr.bf16.mxu1 %v2130_v0  ;;  %v2182_v62 = vld [vmem:[%s2993_s1 + $0x3c0] ss:$20 sps:$4 sm:$0xff]   ;;  %v2185_v63 = vld [vmem:[%s2993_s1 + $0x3c8] ss:$20 sps:$4 sm:$0xff]  }
  0x41   : > { %v2190_v0 = vld [vmem:[%s2993_s1 + $0x3ec] ss:$20 sps:$4 sm:$0xff]  }
  0x43   : > { %1259 = vmatpush1.bf16.msra.mxu0 %v2132_v1  ;;  %1405 = vmatpush1.bf16.msra.mxu1 %v2133_v2  ;;  %v2193_v1 = vld [vmem:[%s2993_s1 + $0x3f4] ss:$20 sps:$4 sm:$0xff]  }
  0x44   : > { %1301 = vmatprep.subr.bf16.mxu0 %v2136_v3  ;;  %1447 = vmatprep.subr.bf16.mxu1 %v2139_v6  ;;  %v2188_v2 = vld [vmem:[%s2993_s1 + $0x3e8] ss:$20 sps:$4 sm:$0xff]   ;;  %v2191_v3 = vld [vmem:[%s2993_s1 + $0x3f0] ss:$20 sps:$4 sm:$0xff]  }
  0x45   : > { %v2194_v6 = vld [vmem:[%s2993_s1 + $0x410] ss:$20 sps:$4 sm:$0xff]  }
  0x46   : > { %1261 = vmatmul.mubr.bf16.vlgmr.msra.gmra.mrb[0].mxu0 %v2507_v9  ;;  %1407 = vmatmul.mubr.bf16.vlgmr.msra.gmra.mrb[0].mxu1 %v2507_v9 }
  0x47   : > { %1302 = vmatpush1.bf16.msra.mxu0 %v2134_v7  ;;  %1448 = vmatpush1.bf16.msra.mxu1 %v2137_v8  ;;  %v2197_v7 = vld [vmem:[%s2993_s1 + $0x418] ss:$20 sps:$4 sm:$0xff]   ;;  %v2202_v8 = vld [vmem:[%s2993_s1 + $0x43c] ss:$20 sps:$4 sm:$0xff]  }
  0x48   : > { %1303 = vmatprep.subr.bf16.mxu0 %v2142_v10  ;;  %1449 = vmatprep.subr.bf16.mxu1 %v2145_v11  ;;  %v2205_v10 = vld [vmem:[%s2993_s1 + $0x444] ss:$20 sps:$4 sm:$0xff]  }
  0x49   : > { %1270 = vmatprep.mubr.bf16.mxu0 %v2523_v16  ;;  %1416 = vmatprep.mubr.bf16.mxu1 %v2523_v16  ;;  %v2200_v11 = vld [vmem:[%s2993_s1 + $0x438] ss:$20 sps:$4 sm:$0xff]  }
  0x4b   : > { %1304 = vmatpush1.bf16.msra.mxu0 %v2140_v14  ;;  %1450 = vmatpush1.bf16.msra.mxu1 %v2143_v15  ;;  %v2211_v14 = vld [vmem:[%s2993_s1 + $0x46c] ss:$20 sps:$4 sm:$0xff]  }
  0x4c   : > { %1305 = vmatprep.subr.bf16.mxu0 %v2148_v17  ;;  %1451 = vmatprep.subr.bf16.mxu1 %v2151_v20  ;;  %v2206_v15 = vld [vmem:[%s2993_s1 + $0x460] ss:$20 sps:$4 sm:$0xff]   ;;  %v2209_v17 = vld [vmem:[%s2993_s1 + $0x468] ss:$20 sps:$4 sm:$0xff]  }
  0x4d   : > { %v2212_v20 = vld [vmem:[%s2993_s1 + $0x488] ss:$20 sps:$4 sm:$0xff]  }
  0x4e   : > { %1271 = vmatmul.mubr.bf16.gmra.mrb[4].mxu0 %v2543_v23  ;;  %1417 = vmatmul.mubr.bf16.gmra.mrb[4].mxu1 %v2543_v23 }
  0x4f   : > { %1306 = vmatpush1.bf16.msra.mxu0 %v2146_v21  ;;  %1452 = vmatpush1.bf16.msra.mxu1 %v2149_v22  ;;  %v2215_v21 = vld [vmem:[%s2993_s1 + $0x490] ss:$20 sps:$4 sm:$0xff]  }
  0x50   : > { %1307 = vmatprep.subr.bf16.mxu0 %v2154_v24  ;;  %1453 = vmatprep.subr.bf16.mxu1 %v2157_v27  ;;  %v182_v22 = vld [vmem:[%s2425_s4 + $0x10] sm:$0xff] }
  0x51   : > { %1280 = vmatprep.mubr.bf16.mxu0 %v2559_v30  ;;  %1426 = vmatprep.mubr.bf16.mxu1 %v2559_v30  ;;  %v186_v24 = vld [vmem:[%s2425_s4 + $0x30] sm:$0xff] }
  0x52   : > { %v2222_v27 = vld [vmem:[%s2993_s1 + $0x150] ss:$20 sps:$4 sm:$0xff]  }
  0x53   : > { %1308 = vmatpush1.bf16.msra.mxu0 %v2152_v28  ;;  %1454 = vmatpush1.bf16.msra.mxu1 %v2155_v29  ;;  %v2718_v28 = vpack.c.bf16 %v186_v24, %v182_v22  ;;  %v2218_v29 = vld [vmem:[%s2993_s1 + $0x290] ss:$20 sps:$4 sm:$0xff]  }
  0x54   : > { %1309 = vmatprep.subr.bf16.mxu0 %v2160_v31  ;;  %1455 = vmatprep.subr.bf16.mxu1 %v2163_v34  ;;  %v2723_v31 = vpack.c.bf16 %v195_v26, %v191_v25  ;;  %v2225_v34 = vld [vmem:[%s2993_s1 + $0x178] ss:$20 sps:$4 sm:$0xff]  }
  0x56   : > { %1281 = vmatmul.mubr.bf16.gmra.mrb[8].mxu0 %v2579_v37  ;;  %1427 = vmatmul.mubr.bf16.gmra.mrb[8].mxu1 %v2579_v37 }
  0x57   : > { %1310 = vmatpush1.bf16.msra.mxu0 %v2158_v35  ;;  %1456 = vmatpush1.bf16.msra.mxu1 %v2161_v36  ;;  %v2219_v35 = vld [vmem:[%s2993_s1 + $0x2b8] ss:$20 sps:$4 sm:$0xff]   ;;  %v190_v36 = vld [vmem:[%s2425_s4 + $0x50] sm:$0xff] }
  0x58   : > { %1311 = vmatprep.subr.bf16.mxu0 %v2166_v40  ;;  %1457 = vmatprep.subr.bf16.mxu1 %v2169_v41  ;;  %v203_v40 = vld [vmem:[%s2425_s4 + $0xb8] sm:$0xff] }
  0x59   : > { %1290 = vmatprep.mubr.bf16.mxu0 %v2592_v43  ;;  %1436 = vmatprep.mubr.bf16.mxu1 %v2592_v43  ;;  %v2226_v41 = vld [vmem:[%s2993_s1 + $0x38] ss:$20 sps:$4 sm:$0xff]   ;;  %v2754_v45 = vpack.c.bf16 %v203_v40, %v199_v39 }
  0x5b   : > { %1312 = vmatpush1.bf16.msra.mxu0 %v2164_v42  ;;  %1458 = vmatpush1.bf16.msra.mxu1 %v2167_v44  ;;  %v2749_v42 = vpack.c.bf16 %v194_v38, %v190_v36  ;;  %v2220_v44 = vld [vmem:[%s2993_s1 + $0x2e0] ss:$20 sps:$4 sm:$0xff]  }
  0x5c   : > { %1313 = vmatprep.subr.bf16.mxu0 %v2172_v47  ;;  %1459 = vmatprep.subr.bf16.mxu1 %v2175_v48  ;;  %v2221_v47 = vld [vmem:[%s2993_s1 + $0x308] ss:$20 sps:$4 sm:$0xff]   ;;  %v2229_v48 = vld [vmem:[%s2993_s1 + $0x60] ss:$20 sps:$4 sm:$0xff]  }
  0x5e   : > { %1291 = vmatmul.mubr.bf16.gmra.mrb[12].mxu0 %v2610_v51  ;;  %1437 = vmatmul.mubr.bf16.gmra.mrb[12].mxu1 %v2610_v51 }
  0x5f   : > { %1314 = vmatpush1.bf16.msra.mxu0 %v2170_v53  ;;  %1460 = vmatpush1.bf16.msra.mxu1 %v2173_v54  ;;  %v2231_v53 = vld [vmem:[%s2993_s1 + $0x1c8] ss:$20 sps:$4 sm:$0xff]  }
  0x60   : > { %1315 = vmatprep.subr.bf16.mxu0 %v2178_v55  ;;  %1461 = vmatprep.subr.bf16.mxu1 %v2181_v56  ;;  %v207_v54 = vld [vmem:[%s2425_s4 + $0xd8] sm:$0xff]  ;;  %v2780_v56 = vpack.c.bf16 %v202_v52, %v198_v49 }
  0x61   : > { %1909 = vmatprep.mubr.msk.bf16.mxu0 %vm1215_vm0, %v2625_v57  ;;  %1913 = vmatprep.mubr.msk.bf16.mxu1 %vm1215_vm0, %v2625_v57  ;;  %v211_v55 = vld [vmem:[%s2425_s4 + $0xf8] sm:$0xff] }
  0x63   : > { %1316 = vmatpush1.bf16.msra.mxu0 %v2176_v58  ;;  %1462 = vmatpush1.bf16.msra.mxu1 %v2179_v59  ;;  %v2224_v58 = vld [vmem:[%s2993_s1 + $0x330] ss:$20 sps:$4 sm:$0xff]   ;;  %v2785_v59 = vpack.c.bf16 %v211_v55, %v207_v54 }
  0x64   : > { %1317 = vmatprep.subr.bf16.mxu0 %v2184_v60  ;;  %1463 = vmatprep.subr.bf16.mxu1 %v2187_v61  ;;  %v2232_v60 = vld [vmem:[%s2993_s1 + $0x88] ss:$20 sps:$4 sm:$0xff]   ;;  %v2234_v61 = vld [vmem:[%s2993_s1 + $0x1f0] ss:$20 sps:$4 sm:$0xff]  }
  0x67   : > { %1318 = vmatpush1.bf16.msra.mxu0 %v2182_v62  ;;  %1464 = vmatpush1.bf16.msra.mxu1 %v2185_v63  ;;  %v2227_v62 = vld [vmem:[%s2993_s1 + $0x358] ss:$20 sps:$4 sm:$0xff]   ;;  %v206_v63 = vld [vmem:[%s2425_s4 + $0xd0] sm:$0xff] }
  0x68   : > { %1319 = vmatprep.subr.bf16.mxu0 %v2190_v0  ;;  %1465 = vmatprep.subr.bf16.mxu1 %v2193_v1  ;;  %v210_v0 = vld [vmem:[%s2425_s4 + $0xf0] sm:$0xff] }
  0x69   : > { %v2235_v1 = vld [vmem:[%s2993_s1 + $0xb0] ss:$20 sps:$4 sm:$0xff]  }
  0x6b   : > { %1320 = vmatpush1.bf16.msra.mxu0 %v2188_v2  ;;  %1466 = vmatpush1.bf16.msra.mxu1 %v2191_v3  ;;  %v226_v2 = vpack.c.bf16 %v210_v0, %v206_v63  ;;  %v2230_v3 = vld [vmem:[%s2993_s1 + $0x380] ss:$20 sps:$4 sm:$0xff]  }
  0x6c   : > { %1321 = vmatprep.subr.bf16.mxu0 %v2196_v4  ;;  %1467 = vmatprep.subr.bf16.mxu1 %v2199_v5  ;;  %v2237_v4 = vld [vmem:[%s2993_s1 + $0x218] ss:$20 sps:$4 sm:$0xff]  }
  0x6d   : > { %v2238_v5 = vld [vmem:[%s2993_s1 + $0xd8] ss:$20 sps:$4 sm:$0xff]  }
  0x6f   : > { %1322 = vmatpush1.bf16.msra.mxu0 %v2194_v6  ;;  %1468 = vmatpush1.bf16.msra.mxu1 %v2197_v7  ;;  %v2240_v6 = vld [vmem:[%s2993_s1 + $0x240] ss:$20 sps:$4 sm:$0xff]   ;;  %v2233_v7 = vld [vmem:[%s2993_s1 + $0x3a8] ss:$20 sps:$4 sm:$0xff]  }
  0x70   : > { %1323 = vmatprep.subr.bf16.mxu0 %v2202_v8  ;;  %1469 = vmatprep.subr.bf16.mxu1 %v2205_v10  ;;  %v2241_v8 = vld [vmem:[%s2993_s1 + $0x100] ss:$20 sps:$4 sm:$0xff]   ;;  %v2243_v10 = vld [vmem:[%s2993_s1 + $0x268] ss:$20 sps:$4 sm:$0xff]  }
  0x73   : > { %1324 = vmatpush1.bf16.msra.mxu0 %v2200_v11  ;;  %1470 = vmatpush1.bf16.msra.mxu1 %v2203_v12  ;;  %v2236_v11 = vld [vmem:[%s2993_s1 + $0x3d0] ss:$20 sps:$4 sm:$0xff]   ;;  %v2242_v12 = vld [vmem:[%s2993_s1 + $0x420] ss:$20 sps:$4 sm:$0xff]  }
  0x74   : > { %1325 = vmatprep.subr.bf16.mxu0 %v2208_v13  ;;  %1471 = vmatprep.subr.bf16.mxu1 %v2211_v14  ;;  %v2245_v13 = vld [vmem:[%s2993_s1 + $0x448] ss:$20 sps:$4 sm:$0xff]   ;;  %v2246_v14 = vld [vmem:[%s2993_s1 + $0x470] ss:$20 sps:$4 sm:$0xff]  }
  0x77   : > { %1326 = vmatpush1.bf16.msra.mxu0 %v2206_v15  ;;  %1472 = vmatpush1.bf16.msra.mxu1 %v2209_v17 }
  0x78   : > { %1327 = vmatprep.subr.bf16.mxu0 %v2214_v18  ;;  %1473 = vmatprep.subr.bf16.mxu1 %v2217_v19 }
  0x7b   : > { %1328 = vmatpush1.bf16.msra.mxu0 %v2212_v20  ;;  %1474 = vmatpush1.bf16.msra.mxu1 %v2215_v21 }
  0x7c   : > { %1585 = vmatprep.subr.bf16.mxu1 %v2256_v32  ;;  %1924 = vmatprep.subr.bf16.mxu0 %v2222_v27 }
  0x7e   : > { %1334 = vmatmul.mubr.bf16.vlgmr.msra.gmra.mrb[0].mxu0 %v2718_v28  ;;  %1480 = vmatmul.mubr.bf16.vlgmr.msra.gmra.mrb[0].mxu1 %v2718_v28 }
  0x7f   : > { %1586 = vmatpush1.bf16.msra.mxu1 %v2218_v29  ;;  %1910 = vmatprep.mubr.msk.bf16.mxu0 %vm1215_vm0, %v2723_v31 }
  0x80   : > { %1587 = vmatprep.subr.bf16.mxu1 %v2256_v32  ;;  %1914 = vmatprep.mubr.msk.bf16.mxu1 %vm1215_vm0, %v2723_v31 }
  0x81   : > { %1925 = vmatpush3.bf16.msra.mxu0 %v2223_v33 }
  0x82   : > { %1926 = vmatprep.subr.bf16.mxu0 %v2225_v34 }
  0x83   : > { %1588 = vmatpush1.bf16.msra.mxu1 %v2219_v35 }
  0x84   : > { %1589 = vmatprep.subr.bf16.mxu1 %v2256_v32 }
  0x85   : > { %1927 = vmatpush3.bf16.msra.mxu0 %v2226_v41 }
  0x86   : > { %1344 = vmatmul.mubr.bf16.gmra.mrb[4].mxu0 %v2749_v42  ;;  %1490 = vmatmul.mubr.bf16.gmra.mrb[4].mxu1 %v2749_v42 }
  0x87   : > { %1590 = vmatpush1.bf16.msra.mxu1 %v2220_v44  ;;  %1911 = vmatprep.mubr.msk.bf16.mxu0 %vm1215_vm0, %v2754_v45 }
  0x88   : > { %1591 = vmatprep.subr.bf16.mxu1 %v2256_v32  ;;  %1915 = vmatprep.mubr.msk.bf16.mxu1 %vm1215_vm0, %v2754_v45 }
  0x89   : > { %1928 = vmatprep.subr.bf16.mxu0 %v2228_v46 }
  0x8a   : > { %1929 = vmatpush3.bf16.msra.mxu0 %v2229_v48 }
  0x8b   : > { %1592 = vmatpush1.bf16.msra.mxu1 %v2221_v47  ;;  %1930 = vmatprep.subr.bf16.mxu0 %v2231_v53 }
  0x8c   : > { %1593 = vmatprep.subr.bf16.mxu1 %v2256_v32 }
  0x8e   : > { %1354 = vmatmul.mubr.bf16.gmra.mrb[8].mxu0 %v2780_v56  ;;  %1500 = vmatmul.mubr.bf16.gmra.mrb[8].mxu1 %v2780_v56 }
  0x8f   : > { %1594 = vmatpush1.bf16.msra.mxu1 %v2224_v58  ;;  %1912 = vmatprep.mubr.msk.bf16.mxu0 %vm1215_vm0, %v2785_v59 }
  0x90   : > { %1595 = vmatprep.subr.bf16.mxu1 %v2256_v32  ;;  %1916 = vmatprep.mubr.msk.bf16.mxu1 %vm1215_vm0, %v2785_v59 }
  0x91   : > { %1931 = vmatpush3.bf16.msra.mxu0 %v2232_v60 }
  0x92   : > { %1932 = vmatprep.subr.bf16.mxu0 %v2234_v61 }
  0x93   : > { %1596 = vmatpush1.bf16.msra.mxu1 %v2227_v62 }
  0x94   : > { %1597 = vmatprep.subr.bf16.mxu1 %v2256_v32 }
  0x95   : > { %1933 = vmatpush3.bf16.msra.mxu0 %v2235_v1 }
  0x96   : > { %1364 = vmatmul.mubr.bf16.gmra.mrb[12].mxu0 %v226_v2  ;;  %1510 = vmatmul.mubr.bf16.gmra.mrb[12].mxu1 %v226_v2 }
  0x97   : > { %1598 = vmatpush1.bf16.msra.mxu1 %v2230_v3  ;;  %1934 = vmatprep.subr.bf16.mxu0 %v2237_v4 }
  0x98   : > { %1599 = vmatprep.subr.bf16.mxu1 %v2256_v32  ;;  %1552 = vmatprep.mubr.bf16.mxu0 %v2441_v50  ;;  %v2244_v50 = vld [vmem:[%s2993_s1 + $0x128] ss:$20 sps:$4 sm:$0xff]  }
  0x99   : > { %1935 = vmatpush3.bf16.msra.mxu0 %v2238_v5  ;;  %1917 = vmatprep.mubr.msk.bf16.mxu1 %vm1215_vm0, %v2625_v57  ;;  %v2239_v57 = vld [vmem:[%s2993_s1 + $0x3f8] ss:$20 sps:$4 sm:$0xff]  }
  0x9a   : > { %1936 = vmatprep.subr.bf16.mxu0 %v2240_v6 }
  0x9b   : > { %1600 = vmatpush1.bf16.msra.mxu1 %v2233_v7 }
  0x9c   : > { %1601 = vmatprep.subr.bf16.mxu1 %v2256_v32 }
  0x9d   : > { %1937 = vmatpush3.bf16.msra.mxu0 %v2241_v8 }
  0x9e   : > { %1938 = vmatprep.subr.bf16.mxu0 %v2243_v10 }
  0x9f   : > { %1602 = vmatpush1.bf16.msra.mxu1 %v2236_v11 }
  0xa0   : > { %1603 = vmatprep.subr.bf16.mxu1 %v2256_v32 }
  0xa1   : > { %1939 = vmatpush3.bf16.msra.mxu0 %v2244_v50 }
  0xa3   : > { %1604 = vmatpush1.bf16.msra.mxu1 %v2239_v57 }
  0xa4   : > { %1605 = vmatprep.subr.bf16.mxu1 %v2256_v32  ;;  %1553 = vmatmul.mubr.bf16.vlgmr.msra.gmra.mrb[16].mxu0 %v2507_v9  ;;  %v2247_v9 = vld [vmem:[%s2993_s1 + $0x498] ss:$20 sps:$4 sm:$0xff]  }
  0xa5   : > { %1560 = vmatprep.mubr.bf16.mxu0 %v2523_v16  ;;  %v410_v16 = vlaneseq }
  0xa7   : > { %1606 = vmatpush1.bf16.msra.mxu1 %v2242_v12 }
  0xa8   : > { %1607 = vmatprep.subr.bf16.mxu1 %v2256_v32 }
  0xab   : > { %1608 = vmatpush1.bf16.msra.mxu1 %v2245_v13 }
  0xac   : > { %1609 = vmatprep.subr.bf16.mxu1 %v2256_v32  ;;  %1561 = vmatmul.mubr.bf16.gmra.mrb[20].mxu0 %v2543_v23  ;;  %v2878_v23 = vshrl.u32 %v410_v16, 7 }
  0xad   : > { %1568 = vmatprep.mubr.bf16.mxu0 %v2559_v30 }
  0xae   : > { %v412_v30 = vsub.s32 0, %v2878_v23  ;;  %v424_v15 = vsub.s32 3, %v2878_v23 }
  0xaf   : > { %1610 = vmatpush1.bf16.msra.mxu1 %v2246_v14 }
  0xb0   : > { %1611 = vmatprep.subr.bf16.mxu1 %v2256_v32 }
  0xb3   : > { %1612 = vmatpush1.bf16.msra.mxu1 %v2247_v9 }
  0xb4   : > { %1569 = vmatmul.mubr.bf16.gmra.mrb[24].mxu0 %v2579_v37  ;;  %v420_v37 = vsub.s32 2, %v2878_v23 }
  0xb5   : > { %1576 = vmatprep.mubr.bf16.mxu0 %v2592_v43  ;;  %v2885_v43 = vld [vmem:[%s2994_s2] sm:$0x1f] }
  0xb6   : > { %1618 = vmatmul.mubr.bf16.vlgmr.msra.gmra.mrb[16].mxu1 %v2718_v28  ;;  %v2891_v17 = vrot.slane %v2885_v43, %v412_v30  ;;  %v2894_v18 = vrot.slane %v2885_v43, %v420_v37  ;;  %v2900_v20 = vrot.slane %v2885_v43, %v424_v15 }
  0xb7   : > { %1918 = vmatprep.mubr.msk.bf16.mxu1 %vm1215_vm0, %v2723_v31 }
  0xbc   : > { %1577 = vmatmul.mubr.bf16.gmra.mrb[28].mxu0 %v2610_v51  ;;  %v416_v51 = vsub.s32 1, %v2878_v23 }
  0xbe   : > { %1626 = vmatmul.mubr.bf16.gmra.mrb[20].mxu1 %v2749_v42  ;;  %v2897_v19 = vrot.slane %v2885_v43, %v416_v51 }
  0xbf   : > { %1919 = vmatprep.mubr.msk.bf16.mxu1 %vm1215_vm0, %v2754_v45 }
  0xc6   : > { %1634 = vmatmul.mubr.bf16.gmra.mrb[24].mxu1 %v2780_v56 }
  0xc7   : > { %1920 = vmatprep.mubr.msk.bf16.mxu1 %vm1215_vm0, %v2785_v59 }
  0xce   : > { %1642 = vmatmul.mubr.bf16.gmra.mrb[28].mxu1 %v226_v2 }
 0x151   : > { %v1335_v21 = vpop.f32.mrb[0].mxu0  ;;  %v1481_v22 = vpop.f32.mrb[0].mxu1 }
 0x152   : > { %v1964_v24 = vadd.f32 %v1335_v21, %v2891_v17  ;;  %v1980_v25 = vadd.f32 %v1481_v22, %v2894_v18  ;;  %v1337_v26 = vpop.f32.mrb[1].mxu0  ;;  %v1483_v27 = vpop.f32.mrb[1].mxu1 }
 0x153   : > { %v1965_v28 = vadd.f32 %v1337_v26, %v2897_v19  ;;  %v1981_v29 = vadd.f32 %v1483_v27, %v2900_v20  ;;  %v1339_v31 = vpop.f32.mrb[2].mxu0  ;;  %v1485_v32 = vpop.f32.mrb[2].mxu1 }
 0x154   : > { %1650 = vst [vmem:[%s2905_s30] sm:$0xff] %v1964_v24  ;;  %1652 = vst [vmem:[%s2905_s30 + $0x10] sm:$0xff] %v1980_v25  ;;  %v1966_v33 = vadd.f32 %v1339_v31, %v2891_v17  ;;  %v1982_v34 = vadd.f32 %v1485_v32, %v2894_v18  ;;  %v1341_v35 = vpop.f32.mrb[3].mxu0  ;;  %v1487_v36 = vpop.f32.mrb[3].mxu1 }
 0x155   : > { %1651 = vst [vmem:[%s2905_s30 + $0x8] sm:$0xff] %v1965_v28  ;;  %1653 = vst [vmem:[%s2905_s30 + $0x18] sm:$0xff] %v1981_v29  ;;  %v1967_v38 = vadd.f32 %v1341_v35, %v2897_v19  ;;  %v1983_v39 = vadd.f32 %v1487_v36, %v2900_v20 }
 0x156   : > { %1656 = vst [vmem:[%s2905_s30 + $0x28] sm:$0xff] %v1966_v33  ;;  %1658 = vst [vmem:[%s2905_s30 + $0x38] sm:$0xff] %v1982_v34 }
 0x157   : > { %1657 = vst [vmem:[%s2905_s30 + $0x30] sm:$0xff] %v1967_v38  ;;  %1659 = vst [vmem:[%s2905_s30 + $0x40] sm:$0xff] %v1983_v39 }
 0x159   : > { %v1345_v40 = vpop.f32.mrb[4].mxu0  ;;  %v1491_v41 = vpop.f32.mrb[4].mxu1 }
 0x15a   : > { %v1968_v42 = vadd.f32 %v1345_v40, %v2891_v17  ;;  %v1984_v44 = vadd.f32 %v1491_v41, %v2894_v18  ;;  %v1347_v45 = vpop.f32.mrb[5].mxu0  ;;  %v1493_v46 = vpop.f32.mrb[5].mxu1 }
 0x15b   : > { %v1969_v47 = vadd.f32 %v1347_v45, %v2897_v19  ;;  %v1985_v48 = vadd.f32 %v1493_v46, %v2900_v20  ;;  %v1349_v49 = vpop.f32.mrb[6].mxu0  ;;  %v1495_v52 = vpop.f32.mrb[6].mxu1 }
 0x15c   : > { %1661 = vst [vmem:[%s2905_s30 + $0x50] sm:$0xff] %v1968_v42  ;;  %1663 = vst [vmem:[%s2905_s30 + $0x60] sm:$0xff] %v1984_v44  ;;  %v1970_v53 = vadd.f32 %v1349_v49, %v2891_v17  ;;  %v1986_v54 = vadd.f32 %v1495_v52, %v2894_v18  ;;  %v1351_v55 = vpop.f32.mrb[7].mxu0  ;;  %v1497_v56 = vpop.f32.mrb[7].mxu1 }
 0x15d   : > { %1662 = vst [vmem:[%s2905_s30 + $0x58] sm:$0xff] %v1969_v47  ;;  %1664 = vst [vmem:[%s2905_s30 + $0x68] sm:$0xff] %v1985_v48  ;;  %v1971_v58 = vadd.f32 %v1351_v55, %v2897_v19  ;;  %v1987_v59 = vadd.f32 %v1497_v56, %v2900_v20 }
 0x15e   : > { %1666 = vst [vmem:[%s2905_s30 + $0x78] sm:$0xff] %v1970_v53  ;;  %1668 = vst [vmem:[%s2905_s30 + $0x88] sm:$0xff] %v1986_v54 }
 0x15f   : > { %1667 = vst [vmem:[%s2905_s30 + $0x80] sm:$0xff] %v1971_v58  ;;  %1669 = vst [vmem:[%s2905_s30 + $0x90] sm:$0xff] %v1987_v59 }
 0x161   : > { %v1355_v60 = vpop.f32.mrb[8].mxu0  ;;  %v1501_v61 = vpop.f32.mrb[8].mxu1 }
 0x162   : > { %v1972_v62 = vadd.f32 %v1355_v60, %v2891_v17  ;;  %v1988_v63 = vadd.f32 %v1501_v61, %v2894_v18  ;;  %v1357_v0 = vpop.f32.mrb[9].mxu0  ;;  %v1503_v1 = vpop.f32.mrb[9].mxu1 }
 0x163   : > { %v1973_v2 = vadd.f32 %v1357_v0, %v2897_v19  ;;  %v1989_v3 = vadd.f32 %v1503_v1, %v2900_v20  ;;  %v1359_v4 = vpop.f32.mrb[10].mxu0  ;;  %v1505_v5 = vpop.f32.mrb[10].mxu1 }
 0x164   : > { %1671 = vst [vmem:[%s2905_s30 + $0xa0] sm:$0xff] %v1972_v62  ;;  %1673 = vst [vmem:[%s2905_s30 + $0xb0] sm:$0xff] %v1988_v63  ;;  %v1974_v6 = vadd.f32 %v1359_v4, %v2891_v17  ;;  %v1990_v7 = vadd.f32 %v1505_v5, %v2894_v18  ;;  %v1361_v8 = vpop.f32.mrb[11].mxu0  ;;  %v1507_v10 = vpop.f32.mrb[11].mxu1 }
 0x165   : > { %1672 = vst [vmem:[%s2905_s30 + $0xa8] sm:$0xff] %v1973_v2  ;;  %1674 = vst [vmem:[%s2905_s30 + $0xb8] sm:$0xff] %v1989_v3  ;;  %v1975_v11 = vadd.f32 %v1361_v8, %v2897_v19  ;;  %v1991_v50 = vadd.f32 %v1507_v10, %v2900_v20 }
 0x166   : > { %1676 = vst [vmem:[%s2905_s30 + $0xc8] sm:$0xff] %v1974_v6  ;;  %1678 = vst [vmem:[%s2905_s30 + $0xd8] sm:$0xff] %v1990_v7 }
 0x167   : > { %1677 = vst [vmem:[%s2905_s30 + $0xd0] sm:$0xff] %v1975_v11  ;;  %1679 = vst [vmem:[%s2905_s30 + $0xe0] sm:$0xff] %v1991_v50 }
 0x169   : > { %v1365_v57 = vpop.f32.mrb[12].mxu0  ;;  %v1511_v12 = vpop.f32.mrb[12].mxu1 }
 0x16a   : > { %v1976_v13 = vadd.f32 %v1365_v57, %v2891_v17  ;;  %v1992_v14 = vadd.f32 %v1511_v12, %v2894_v18  ;;  %v1367_v9 = vpop.f32.mrb[13].mxu0  ;;  %v1513_v16 = vpop.f32.mrb[13].mxu1 }
 0x16b   : > { %v1977_v30 = vadd.f32 %v1367_v9, %v2897_v19  ;;  %v1993_v37 = vadd.f32 %v1513_v16, %v2900_v20  ;;  %v1369_v51 = vpop.f32.mrb[14].mxu0  ;;  %v1515_v15 = vpop.f32.mrb[14].mxu1 }
 0x16c   : > { %1681 = vst [vmem:[%s2905_s30 + $0xf0] sm:$0xff] %v1976_v13  ;;  %1683 = vst [vmem:[%s2905_s30 + $0x100] sm:$0xff] %v1992_v14  ;;  %v1978_v21 = vadd.f32 %v1369_v51, %v2891_v17  ;;  %v1994_v22 = vadd.f32 %v1515_v15, %v2894_v18  ;;  %v1371_v24 = vpop.f32.mrb[15].mxu0  ;;  %v1517_v25 = vpop.f32.mrb[15].mxu1  ;;  %v428_v18 = vsub.s32 4, %v2878_v23 }
 0x16d   : > { %1682 = vst [vmem:[%s2905_s30 + $0xf8] sm:$0xff] %v1977_v30  ;;  %1684 = vst [vmem:[%s2905_s30 + $0x108] sm:$0xff] %v1993_v37  ;;  %v1979_v26 = vadd.f32 %v1371_v24, %v2897_v19  ;;  %v1995_v27 = vadd.f32 %v1517_v25, %v2900_v20 }
 0x16e   : > { %1686 = vst [vmem:[%s2905_s30 + $0x118] sm:$0xff] %v1978_v21  ;;  %1688 = vst [vmem:[%s2905_s30 + $0x128] sm:$0xff] %v1994_v22  ;;  %v429_v19 = vrot.slane %v2885_v43, %v428_v18 }
 0x16f   : > { %1687 = vst [vmem:[%s2905_s30 + $0x120] sm:$0xff] %v1979_v26  ;;  %1689 = vst [vmem:[%s2905_s30 + $0x130] sm:$0xff] %v1995_v27 }
 0x177   : > { %v1940_v28 = vpop.f32.mrb[16].mxu0 }
 0x178   : > { %v1941_v29 = vpop.f32.mrb[17].mxu0 }
 0x179   : > { %v1942_v31 = vadd.f32 %v1941_v29, %v1940_v28  ;;  %v1943_v32 = vpop.f32.mrb[18].mxu0 }
 0x17a   : > { %v1944_v33 = vpop.f32.mrb[19].mxu0 }
 0x17b   : > { %v1945_v17 = vadd.f32 %v1944_v33, %v1943_v32  ;;  %v1555_v40 = vadd.f32 %v1942_v31, %v429_v19 }
 0x17d   : > { %v1558_v23 = vadd.f32 %v1945_v17, %v429_v19 }
 0x17f   : > { %v1946_v34 = vpop.f32.mrb[20].mxu0 }
 0x180   : > { %v1947_v35 = vpop.f32.mrb[21].mxu0 }
 0x181   : > { %v1948_v36 = vadd.f32 %v1947_v35, %v1946_v34  ;;  %v1949_v38 = vpop.f32.mrb[22].mxu0 }
 0x182   : > { %v1950_v20 = vpop.f32.mrb[23].mxu0 }
 0x183   : > { %v1951_v39 = vadd.f32 %v1950_v20, %v1949_v38  ;;  %v1563_v55 = vadd.f32 %v1948_v36, %v429_v19 }
 0x185   : > { %v1566_v0 = vadd.f32 %v1951_v39, %v429_v19 }
 0x187   : > { %v1952_v41 = vpop.f32.mrb[24].mxu0 }
 0x188   : > { %v1953_v42 = vpop.f32.mrb[25].mxu0 }
 0x189   : > { %v1619_v44 = vpop.f32.mrb[16].mxu1  ;;  %v1954_v45 = vadd.f32 %v1953_v42, %v1952_v41  ;;  %v1955_v46 = vpop.f32.mrb[26].mxu0 }
 0x18a   : > { %v1620_v47 = vadd.f32 %v1619_v44, %v1555_v40  ;;  %v1621_v48 = vpop.f32.mrb[17].mxu1  ;;  %v1956_v49 = vpop.f32.mrb[27].mxu0 }
 0x18b   : > { %v1622_v52 = vpop.f32.mrb[18].mxu1  ;;  %v1957_v53 = vadd.f32 %v1956_v49, %v1955_v46  ;;  %v1571_v6 = vadd.f32 %v1954_v45, %v429_v19 }
 0x18c   : > { %1655 = vst.msk [vmem:[%s2905_s30 + $0x20] sm:$0xff] %vm1654_vm1, %v1620_v47  ;;  %v1623_v43 = vadd.f32 %v1622_v52, %v1558_v23  ;;  %v1624_v54 = vpop.f32.mrb[19].mxu1 }
 0x18d   : > { %v1574_v11 = vadd.f32 %v1957_v53, %v429_v19 }
 0x18e   : > { %1660 = vst.msk [vmem:[%s2905_s30 + $0x48] sm:$0xff] %vm1654_vm1, %v1623_v43 }
 0x18f   : > { %v1958_v56 = vpop.f32.mrb[28].mxu0 }
 0x190   : > { %v1959_v58 = vpop.f32.mrb[29].mxu0 }
 0x191   : > { %v1627_v59 = vpop.f32.mrb[20].mxu1  ;;  %v1960_v60 = vadd.f32 %v1959_v58, %v1958_v56  ;;  %v1961_v61 = vpop.f32.mrb[30].mxu0 }
 0x192   : > { %v1628_v62 = vadd.f32 %v1627_v59, %v1563_v55  ;;  %v1629_v63 = vpop.f32.mrb[21].mxu1  ;;  %v1962_v1 = vpop.f32.mrb[31].mxu0 }
 0x193   : > { %v1630_v2 = vpop.f32.mrb[22].mxu1  ;;  %v1963_v3 = vadd.f32 %v1962_v1, %v1961_v61  ;;  %v1579_v13 = vadd.f32 %v1960_v60, %v429_v19 }
 0x194   : > { %1665 = vst.msk [vmem:[%s2905_s30 + $0x70] sm:$0xff] %vm1654_vm1, %v1628_v62  ;;  %v1631_v4 = vadd.f32 %v1630_v2, %v1566_v0  ;;  %v1632_v5 = vpop.f32.mrb[23].mxu1 }
 0x195   : > { %v1582_v30 = vadd.f32 %v1963_v3, %v429_v19 }
 0x196   : > { %1670 = vst.msk [vmem:[%s2905_s30 + $0x98] sm:$0xff] %vm1654_vm1, %v1631_v4 }
 0x199   : > { %v1635_v7 = vpop.f32.mrb[24].mxu1 }
 0x19a   : > { %v1636_v8 = vadd.f32 %v1635_v7, %v1571_v6  ;;  %v1637_v10 = vpop.f32.mrb[25].mxu1 }
 0x19b   : > { %v1638_v50 = vpop.f32.mrb[26].mxu1 }
 0x19c   : > { %1675 = vst.msk [vmem:[%s2905_s30 + $0xc0] sm:$0xff] %vm1654_vm1, %v1636_v8  ;;  %v1639_v57 = vadd.f32 %v1638_v50, %v1574_v11  ;;  %v1640_v12 = vpop.f32.mrb[27].mxu1 }
 0x19e   : > { %1680 = vst.msk [vmem:[%s2905_s30 + $0xe8] sm:$0xff] %vm1654_vm1, %v1639_v57 }
 0x1a1   : > { %v1643_v14 = vpop.f32.mrb[28].mxu1 }
 0x1a2   : > { %v1644_v9 = vadd.f32 %v1643_v14, %v1579_v13  ;;  %v1645_v16 = vpop.f32.mrb[29].mxu1 }
 0x1a3   : > { %v1646_v37 = vpop.f32.mrb[30].mxu1 }
 0x1a4   : > { %1685 = vst.msk [vmem:[%s2905_s30 + $0x110] sm:$0xff] %vm1654_vm1, %v1644_v9  ;;  %v1647_v51 = vadd.f32 %v1646_v37, %v1582_v30  ;;  %v1648_v15 = vpop.f32.mrb[31].mxu1 }
 0x1a6   : > { %1690 = vst.msk [vmem:[%s2905_s30 + $0x138] sm:$0xff] %vm1654_vm1, %v1647_v51 }
 0x1a7 PF: > { %s13_s12 = sadd.s32 1, %s2254_s12  }
 0x1a8   : > { %p10_p4 = scmp.ge.s32.totalorder %s13_s12, 4  }
 0x1aa   :  { %12 = sbr.rel (!%p10_p4) target bundleno = 1 (0x1), region = 62 }

</bundles_post_ra>
